<compile_context>
chip_gen: v7x
topology: tpu7x:2x2x1
jax: 0.10.0
libtpu: 0.0.40
codegen_flags: <defaults>
</compile_context>

<pallas_src>
import functools

import jax
import jax.numpy as jnp
from jax import lax
from jax.experimental import pallas as pl
from jax.experimental.pallas import tpu as pltpu

PUTIN = 54    # input/output feature dim  (putin)
PUTOUT = 180  # hidden feature dim        (putout)


def _round_up(x, m):
    return ((x + m - 1) // m) * m


def _pick_tile_m(m):
    """Row-tile heuristic: one full block for small M, else >=2 big blocks."""
    if m <= 512:
        # Block first dim == full array dim -> always a legal block shape,
        # no ragged edge, no wasted DMA/MXU work on padded rows.
        return m
    # Large M: at least 2 grid steps (v7x has 2 TensorCores sharing the
    # "parallel" axis), up to 1024 rows per block.  Double-buffered x + out
    # blocks plus the resident weights stay far under scoped VMEM on every
    # generation, so no vmem_limit_bytes bump is needed.
    return min(1024, _round_up(pl.cdiv(m, 2), 256))


def _fused_kernel(x_ref, w_ref, b_ref, o_ref, *, precision):
    # motion_fc_out(motion_fc_in(x)) with the identity-KAN stub folds into a
    # single (tile_m,54)@(54,54) matmul + bias.
    a = x_ref[...].astype(w_ref.dtype)            # in-kernel cast: no HBM pass
    y = jnp.dot(a, w_ref[...],
                preferred_element_type=jnp.float32, precision=precision)
    y = y + b_ref[...]                             # f32 bias add
    o_ref[...] = y.astype(o_ref.dtype)


def _two_matmul_kernel(x_ref, w_in_ref, b_in_ref, w_out_ref, b_out_ref, o_ref,
                       *, precision):
    # motion_fc_in
    a = x_ref[...].astype(w_in_ref.dtype)
    h = jnp.dot(a, w_in_ref[...],
                preferred_element_type=jnp.float32, precision=precision)
    h = h + b_in_ref[...]
    # TODO(synk): kan_layers(config.motion_kan) / LucasKAN definitions are not
    # part of the provided module source; motion_kan is applied as identity.
    # The 'b n d -> b d n' / 'b d n -> b n d' rearranges around it cancel
    # algebraically and are intentionally not materialized (no XLU transposes).
    h = h.astype(w_out_ref.dtype)
    # motion_fc_out
    y = jnp.dot(h, w_out_ref[...],
                preferred_element_type=jnp.float32, precision=precision)
    y = y + b_out_ref[...]
    o_ref[...] = y.astype(o_ref.dtype)


def lightkan_forward(x, w_in, b_in, w_out, b_out, *, tile_m=None, fuse=True,
                     kan_is_identity=True, compute_dtype=jnp.float32):
    """LightKAN forward.  x: (B, N, 54) -> (B, N, 54)."""
    B, N, D = x.shape
    assert D == PUTIN
    if fuse and not kan_is_identity:
        # Folding the two Linears (and dropping the transposes) is only exact
        # while motion_kan is the identity stub.
        raise ValueError("fuse=True requires kan_is_identity=True")
    out_dtype = x.dtype

    M = B * N
    if tile_m is None:
        tile_m = _pick_tile_m(M)
    else:
        tile_m = max(8, min(tile_m, _round_up(M, 8)))
        if tile_m != M and tile_m % 8:
            tile_m = _round_up(tile_m, 8)
    grid_m = pl.cdiv(M, tile_m)  # ragged last block handled by Pallas masking

    # f32 inputs -> exact (HIGHEST); bf16 inputs -> DEFAULT, f32 accumulation.
    precision = (lax.Precision.HIGHEST if compute_dtype == jnp.float32
                 else lax.Precision.DEFAULT)

    # Flatten (B, N) into rows.  No padding, no host-side dtype passes.
    xf = x.reshape(M, PUTIN)

    b_in_f = b_in.reshape(1, PUTOUT).astype(jnp.float32)
    b_out_f = b_out.reshape(1, PUTIN).astype(jnp.float32)

    x_spec = pl.BlockSpec((tile_m, PUTIN), lambda i: (i, 0))
    o_spec = pl.BlockSpec((tile_m, PUTIN), lambda i: (i, 0))
    out_shape = jax.ShapeDtypeStruct((M, PUTIN), out_dtype)
    compiler_params = pltpu.CompilerParams(dimension_semantics=("parallel",))

    x_bytes = M * PUTIN * x.dtype.itemsize
    out_bytes = M * PUTIN * jnp.dtype(out_dtype).itemsize
    w_itemsize = jnp.dtype(compute_dtype).itemsize

    if fuse:
        # Fold the two Linears host-side (tiny (54,180)@(180,54) product;
        # exact while motion_kan is identity).  NOTE: for bf16 compute the
        # fold is done in f32 then cast once, which differs slightly from two
        # bf16 matmuls -- validated at bf16 tolerance in __main__.
        hi = lax.Precision.HIGHEST
        w_f = jnp.matmul(w_in.astype(jnp.float32), w_out.astype(jnp.float32),
                         precision=hi)
        b_f = jnp.matmul(b_in_f, w_out.astype(jnp.float32), precision=hi) + b_out_f
        cost = pl.CostEstimate(
            flops=2 * M * PUTIN * PUTIN, transcendentals=0,
            bytes_accessed=x_bytes + out_bytes
            + PUTIN * PUTIN * w_itemsize + PUTIN * 4)
        y = pl.pallas_call(
            functools.partial(_fused_kernel, precision=precision),
            out_shape=out_shape,
            grid=(grid_m,),
            in_specs=[
                x_spec,
                pl.BlockSpec((PUTIN, PUTIN), lambda i: (0, 0)),  # fused W (VMEM-resident)
                pl.BlockSpec((1, PUTIN), lambda i: (0, 0)),      # fused bias (f32)
            ],
            out_specs=o_spec,
            compiler_params=compiler_params,
            cost_estimate=cost,
        )(xf, w_f.astype(compute_dtype), b_f)
    else:
        cost = pl.CostEstimate(
            flops=4 * M * PUTIN * PUTOUT, transcendentals=0,
            bytes_accessed=x_bytes + out_bytes
            + 2 * PUTIN * PUTOUT * w_itemsize + (PUTIN + PUTOUT) * 4)
        y = pl.pallas_call(
            functools.partial(_two_matmul_kernel, precision=precision),
            out_shape=out_shape,
            grid=(grid_m,),
            in_specs=[
                x_spec,
                pl.BlockSpec((PUTIN, PUTOUT), lambda i: (0, 0)),  # W_in  (54,180)
                pl.BlockSpec((1, PUTOUT), lambda i: (0, 0)),      # b_in  (f32)
                pl.BlockSpec((PUTOUT, PUTIN), lambda i: (0, 0)),  # W_out (180,54)
                pl.BlockSpec((1, PUTIN), lambda i: (0, 0)),       # b_out (f32)
            ],
            out_specs=o_spec,
            compiler_params=compiler_params,
            cost_estimate=cost,
        )(xf, w_in.astype(compute_dtype), b_in_f,
          w_out.astype(compute_dtype), b_out_f)

    return y.reshape(B, N, PUTIN)


def init_params(key, gain=1e-8):
    """Parameter init matching the PyTorch module (gain overridable for tests)."""
    k_win, k_bin, k_wout = jax.random.split(key, 3)

    # motion_fc_in: nn.Linear(54, 180) default init: U(-1/sqrt(fan_in), +...)
    bound = 1.0 / (PUTIN ** 0.5)
    w_in = jax.random.uniform(k_win, (PUTIN, PUTOUT), jnp.float32, -bound, bound)
    b_in = jax.random.uniform(k_bin, (1, PUTOUT), jnp.float32, -bound, bound)

    # motion_fc_out: reset_parameters() -> xavier_uniform_(gain), bias=0
    a = gain * (6.0 / (PUTOUT + PUTIN)) ** 0.5
    w_out = jax.random.uniform(k_wout, (PUTOUT, PUTIN), jnp.float32, -a, a)
    b_out = jnp.zeros((1, PUTIN), jnp.float32)
    return w_in, b_in, w_out, b_out


def lightkan_reference(x, w_in, b_in, w_out, b_out):
    """Pure-JAX reference of the same forward pass (for validation)."""
    hi = lax.Precision.HIGHEST
    h = jnp.matmul(x, w_in, precision=hi) + b_in   # (B, N, 180)
    h = jnp.swapaxes(h, 1, 2)                      # arr0: b n d -> b d n
    # motion_kan identity stub
    h = jnp.swapaxes(h, 1, 2)                      # arr1: b d n -> b n d
    return jnp.matmul(h, w_out, precision=hi) + b_out


if __name__ == "__main__":
    key = jax.random.PRNGKey(0)
    k_x, k_p, k_v = jax.random.split(key, 3)

    # Module-consistent small shape: batch=2, seq (dct length)=8, features=54.
    B, N = 2, 8
    x = jax.random.normal(k_x, (B, N, PUTIN), dtype=jnp.float32)

    # 1) Module-faithful init (xavier_uniform gain=1e-8 on motion_fc_out).
    params = init_params(k_p, gain=1e-8)
    out = jax.block_until_ready(lightkan_forward(x, *params))
    ref = lightkan_reference(x, *params)
    assert out.shape == (B, N, PUTIN)
    assert jnp.allclose(out, ref, atol=1e-5, rtol=1e-5)

    # 2) Stronger numeric checks with gain=1.0 (motion_fc_out contributes):
    #    fused / two-matmul paths, f32 and bf16 compute, and both single-block
    #    (odd M=21) and multi-block (M=1024, grid=2) row tilings.
    params_v = init_params(k_v, gain=1.0)
    for (Bv, Nv) in ((3, 7), (8, 128)):
        xv = jax.random.normal(jax.random.fold_in(k_x, Bv * 1000 + Nv),
                               (Bv, Nv, PUTIN), dtype=jnp.float32)
        ref_v = lightkan_reference(xv, *params_v)
        for fuse in (True, False):
            o32 = jax.block_until_ready(
                lightkan_forward(xv, *params_v, fuse=fuse))
            assert o32.shape == (Bv, Nv, PUTIN)
            assert jnp.allclose(o32, ref_v, atol=1e-4, rtol=1e-4), (Bv, Nv, fuse)
            obf = jax.block_until_ready(
                lightkan_forward(xv, *params_v, fuse=fuse,
                                 compute_dtype=jnp.bfloat16))
            assert jnp.allclose(obf, ref_v, atol=5e-2, rtol=5e-2), (Bv, Nv, fuse, "bf16")

    print("KERNEL_OK")
</pallas_src>

<mosaic_0001>
module attributes {stable_mosaic.version = 11 : i64} {
  func.func @_fused_kernel(%arg0: i32, %arg1: memref<16x54xf32, #tpu.memory_space<vmem>>, %arg2: memref<54x54xf32, #tpu.memory_space<vmem>>, %arg3: memref<1x54xf32, #tpu.memory_space<vmem>>, %arg4: memref<16x54xf32, #tpu.memory_space<vmem>>) attributes {dimension_semantics = [#tpu.dimension_semantics<parallel>], iteration_bounds = array<i64: 1>, scalar_prefetch = 0 : i64, scratch_operands = 0 : i64, tpu.core_type = #tpu.core_type<tc>, window_params = [{transform_indices = @transform_0, window_bounds = array<i64: 16, 54>}, {pipeline_mode = #tpu.pipeline_mode<synchronous>, transform_indices = @transform_1, window_bounds = array<i64: 54, 54>}, {pipeline_mode = #tpu.pipeline_mode<synchronous>, transform_indices = @transform_2, window_bounds = array<i64: 1, 54>}, {transform_indices = @transform_3, window_bounds = array<i64: 16, 54>}]} {
    %c0 = arith.constant 0 : index
    %c0_0 = arith.constant 0 : index
    %0 = vector.load %arg1[%c0, %c0_0] : memref<16x54xf32, #tpu.memory_space<vmem>>, vector<16x54xf32>
    %c0_1 = arith.constant 0 : index
    %c0_2 = arith.constant 0 : index
    %1 = vector.load %arg2[%c0_1, %c0_2] : memref<54x54xf32, #tpu.memory_space<vmem>>, vector<54x54xf32>
    %cst = arith.constant dense<0.000000e+00> : vector<16x54xf32>
    %2 = tpu.matmul %0, %1, %cst {dimension_numbers = #tpu.dot_dimension_numbers<[1], [0], [0], [1], [0, 0, 1, 1], [], []>, precision = #tpu.contract_precision<fp32>} : vector<16x54xf32>, vector<54x54xf32>, vector<16x54xf32> -> vector<16x54xf32>
    %c0_3 = arith.constant 0 : index
    %c0_4 = arith.constant 0 : index
    %3 = vector.load %arg3[%c0_3, %c0_4] : memref<1x54xf32, #tpu.memory_space<vmem>>, vector<1x54xf32>
    %4 = vector.broadcast %3 : vector<1x54xf32> to vector<16x54xf32>
    %5 = arith.addf %2, %4 : vector<16x54xf32>
    %c0_5 = arith.constant 0 : index
    %c0_6 = arith.constant 0 : index
    %6 = vector.load %arg4[%c0_5, %c0_6] : memref<16x54xf32, #tpu.memory_space<vmem>>, vector<16x54xf32>
    tpu.vector_store %arg4[%c0_5, %c0_6], %5 {strides = array<i32>} : memref<16x54xf32, #tpu.memory_space<vmem>>, vector<16x54xf32>,
    return
  }
  func.func @transform_0(%arg0: i32) -> (i32, i32) {
    %c0_i32 = arith.constant 0 : i32
    %c0_i32_0 = arith.constant 0 : i32
    return %arg0, %c0_i32 : i32, i32
  }
  func.func @transform_1(%arg0: i32) -> (i32, i32) {
    %c0_i32 = arith.constant 0 : i32
    %c0_i32_0 = arith.constant 0 : i32
    %c0_i32_1 = arith.constant 0 : i32
    return %c0_i32, %c0_i32_0 : i32, i32
  }
  func.func @transform_2(%arg0: i32) -> (i32, i32) {
    %c0_i32 = arith.constant 0 : i32
    %c0_i32_0 = arith.constant 0 : i32
    %c0_i32_1 = arith.constant 0 : i32
    return %c0_i32, %c0_i32_0 : i32, i32
  }
  func.func @transform_3(%arg0: i32) -> (i32, i32) {
    %c0_i32 = arith.constant 0 : i32
    %c0_i32_0 = arith.constant 0 : i32
    return %arg0, %c0_i32 : i32, i32
  }
}

</mosaic_0001>

<bundles_post_ra>
// kernel: tpu_custom_call.1
= control target key start
LH: loop header
LB: loop body
LE: loop exit
PB: predicated region body
PF: predicated region fallthrough
CT: control target
= control target key end

     0   :  { %8 = vsyncpa [#allocation3], 0  ;;  %s1138_s0 = inlined_call_operand.hbm [shape: f32[16,54], index: 0, kind: input, shape index: {}]   ;;  %s1139_s1 = inlined_call_operand.hbm [shape: f32[54,54], index: 1, kind: input, shape index: {}]   ;;  %s1140_s2 = inlined_call_operand.vmem [shape: f32[1,54], index: 2, kind: input, shape index: {}]   ;;  %s1141_s3 = inlined_call_operand.hbm [shape: f32[16,54], index: 3, kind: output, shape index: {}]  }
   0x1   :  { %9 = vsyncpa [#allocation6], 0 }
   0x2   :  { %10 = vsyncpa [#allocation4], 0  ;;  %s975_s12 = smov [#allocation2]   ;;  %s903_s16 = scalar_lea.hbm %s1138_s0, 256 }
   0x3   :  { %s16_s13 = sshll.u32 %s975_s12, 4  ;;  %p904_p0 = scmp.ne.s32.totalorder %s1138_s0, %s903_s16  ;;  %s17_s13 = int_to_ptr.vmem [resolvable:$true] %s16_s13 }
   0x4   :  { %p907_p1 = scmp.lt.u32.totalorder %s903_s16, %s1138_s0 }
   0x6   :  { %p909_p2 = pnand %p907_p1, %p904_p0 }
   0x8   :  { %912 = shalt.err (!%p909_p2)
}
   0x9   :  { %s913_s21 = scalar_lea.vmem %s17_s13, 256  ;;  %p918_p4 = scmp.lt.s32.totalorder %s17_s13, %s17_s13 }
   0xa   :  { %p914_p3 = scmp.ne.s32.totalorder %s17_s13, %s913_s21  ;;  %p919_p5 = scmp.lt.s32.totalorder %s913_s21, %s913_s21 }
   0xc   :  { %p920_p6 = por %p919_p5, %p918_p4 }
   0xe   :  { %p921_p7 = pnand %p920_p6, %p914_p3 }
  0x10   :  { %924 = shalt.err (!%p921_p7)
}
  0x11   :  { %s976_s22 = smov 128   ;;  %s977_s23 = smov 8  }
  0x12   :  { %22 = dma.hbm_to_vmem [thread:$0]  %s1138_s0, 256, %s17_s13, [#allocation3], %s976_s22, %s976_s22, %s977_s23  }
  0x13   :  { %s978_s26 = smov [#allocation5]   ;;  %s925_s30 = scalar_lea.hbm %s1139_s1, 896 }
  0x14   :  { %s28_s27 = sshll.u32 %s978_s26, 4  ;;  %p926_p8 = scmp.ne.s32.totalorder %s1139_s1, %s925_s30  ;;  %s29_s27 = int_to_ptr.vmem [resolvable:$true] %s28_s27 }
  0x15   :  { %p929_p9 = scmp.lt.u32.totalorder %s925_s30, %s1139_s1 }
  0x17   :  { %p931_p10 = pnand %p929_p9, %p926_p8 }
  0x19   :  { %934 = shalt.err (!%p931_p10)
}
  0x1a   :  { %s935_s8 = scalar_lea.vmem %s29_s27, 896  ;;  %p940_p12 = scmp.lt.s32.totalorder %s29_s27, %s29_s27 }
  0x1b   :  { %p936_p11 = scmp.ne.s32.totalorder %s29_s27, %s935_s8  ;;  %p941_p13 = scmp.lt.s32.totalorder %s935_s8, %s935_s8 }
  0x1d   :  { %p942_p0 = por %p941_p13, %p940_p12 }
  0x1f   :  { %p943_p1 = pnand %p942_p0, %p936_p11 }
  0x21   :  { %946 = shalt.err (!%p943_p1)
}
  0x22   :  { %34 = dma.hbm_to_vmem [thread:$0]  %s1139_s1, 896, %s29_s27, [#allocation6], %s976_s22, %s976_s22, %s977_s23  }
  0x23   :  { %969 = dma.done.wait [#allocation3], 256  }
  0x24   :  { %970 = vsyncadd [#allocation3], 4294967040 }
  0x25   :  { %971 = dma.done.wait [#allocation6], 896  }
  0x26   :  { %972 = vsyncadd [#allocation6], 4294966400  ;;  %v45_v0 = vld [vmem:[#allocation5] sm:$0xff]  ;;  %v46_v1 = vld [vmem:[#allocation5 + $0x8] sm:$0xff]  ;;  %vm59_vm0 = vcmask 441344   ;;  %vm66_vm1 = vcmask 1045504  }
  0x27   :  { %v47_v2 = vld [vmem:[#allocation5 + $0x10] sm:$0xff]  ;;  %v71_v3 = vand.u32 4294901760, %v45_v0  ;;  %v74_v4 = vand.u32 4294901760, %v46_v1  ;;  %v48_v5 = vld [vmem:[#allocation5 + $0x18] sm:$0xff]  ;;  %v49_v7 = vld [vmem:[#allocation5 + $0x20] sm:$0xff]  ;;  %s979_s11 = smov [#allocation7]  }
  0x28   :  { %v77_v6 = vand.u32 4294901760, %v47_v2  ;;  %v50_v8 = vld [vmem:[#allocation5 + $0x28] sm:$0xff]  ;;  %v80_v9 = vand.u32 4294901760, %v48_v5  ;;  %v83_v10 = vand.u32 4294901760, %v49_v7  ;;  %v43_v12 = vld [vmem:[#allocation2] sm:$0xff]  ;;  %v44_v16 = vld [vmem:[#allocation2 + $0x8] sm:$0xff] }
  0x29   :  { %v86_v11 = vand.u32 4294901760, %v50_v8  ;;  %v1030_v13 = vpack.c.bf16 %v74_v4, %v71_v3  ;;  %v61_v14 = vsel %vm59_vm0, %v43_v12, 0  ;;  %v1033_v15 = vsub.f32 %v45_v0, %v71_v3  ;;  %v51_v20 = vld [vmem:[#allocation5 + $0x30] sm:$0x3f]  ;;  %s644_s12 = sshll.u32 %s979_s11, 4  ;;  %s645_s12 = int_to_ptr.vmem [resolvable:$true] %s644_s12 }
  0x2a   :  { %v1035_v17 = vpack.c.bf16 %v80_v9, %v77_v6  ;;  %v1039_v19 = vand.u32 4294901760, %v61_v14  ;;  %v1044_v22 = vsub.f32 %v46_v1, %v74_v4  ;;  %v64_v23 = vsel %vm59_vm0, %v44_v16, 0  ;;  %s947_s13 = scalar_lea.vmem %s645_s12, 256  ;;  %p952_p3 = scmp.lt.s32.totalorder %s645_s12, %s645_s12 }
  0x2b   :  { %v1037_v18 = vpack.c.bf16 %v86_v11, %v83_v10  ;;  %815 = vmatprep.subr.bf16.mxu1 %v1030_v13  ;;  %851 = vmatprep.subr.bf16.mxu0 %v1030_v13  ;;  %v165_v21 = vand.u32 4294901760, %v1033_v15  ;;  %v1047_v24 = vsub.f32 %v47_v2, %v77_v6  ;;  %v1054_v26 = vand.u32 4294901760, %v64_v23  ;;  %p948_p2 = scmp.ne.s32.totalorder %s645_s12, %s947_s13  ;;  %p953_p4 = scmp.lt.s32.totalorder %s947_s13, %s947_s13 }
  0x2c   :  { %817 = vmatpush3.bf16.msra.mxu1 %v1030_v13  ;;  %853 = vmatpush3.bf16.msra.mxu0 %v1030_v13  ;;  %v1052_v25 = vsub.f32 %v61_v14, %v1039_v19  ;;  %v1056_v27 = vsub.f32 %v48_v5, %v80_v9  ;;  %v1058_v28 = vsub.f32 %v49_v7, %v83_v10  ;;  %v172_v30 = vand.u32 4294901760, %v1044_v22  ;;  %v657_v5 = vld [vmem:[%s1140_s2] ss:$0 sm:$0xff] }
  0x2d   :  { %819 = vmatprep.subr.bf16.mxu1 %v1035_v17  ;;  %855 = vmatprep.subr.bf16.mxu0 %v1035_v17  ;;  %v166_v29 = vsub.f32 %v1033_v15, %v165_v21  ;;  %v179_v31 = vand.u32 4294901760, %v1047_v24  ;;  %v1065_v32 = vsub.f32 %v50_v8, %v86_v11  ;;  %v68_v33 = vsel %vm66_vm1, %v51_v20, 0  ;;  %p954_p5 = por %p953_p4, %p952_p3 }
  0x2e   :  { %v144_v34 = vand.u32 4294901760, %v1052_v25  ;;  %v1070_v35 = vsub.f32 %v64_v23, %v1054_v26  ;;  %v186_v36 = vand.u32 4294901760, %v1056_v27  ;;  %v173_v37 = vsub.f32 %v1044_v22, %v172_v30 }
  0x2f   :  { %v180_v38 = vsub.f32 %v1047_v24, %v179_v31  ;;  %v193_v42 = vand.u32 4294901760, %v1058_v28  ;;  %v1083_v43 = vand.u32 4294901760, %v68_v33  ;;  %v167_v44 = vand.u32 4294901760, %v166_v29  ;;  %p955_p6 = pnand %p954_p5, %p948_p2 }
  0x30   :  { %821 = vmatpush3.bf16.msra.mxu1 %v1035_v17  ;;  %857 = vmatpush3.bf16.msra.mxu0 %v1035_v17  ;;  %v145_v39 = vsub.f32 %v1052_v25, %v144_v34  ;;  %v154_v40 = vand.u32 4294901760, %v1070_v35  ;;  %v187_v41 = vsub.f32 %v1056_v27, %v186_v36  ;;  %v174_v45 = vand.u32 4294901760, %v173_v37 }
  0x31   :  { %823 = vmatprep.subr.bf16.mxu1 %v1037_v18  ;;  %859 = vmatprep.subr.bf16.mxu0 %v1037_v18  ;;  %v200_v46 = vand.u32 4294901760, %v1065_v32  ;;  %v181_v49 = vand.u32 4294901760, %v180_v38  ;;  %v194_v51 = vsub.f32 %v1058_v28, %v193_v42  ;;  %v206_v53 = vsub.f32 %v68_v33, %v1083_v43 }
  0x32   :  { %v146_v47 = vand.u32 4294901760, %v145_v39  ;;  %777 = vmatprep.mubr.f32.mxu0 %v144_v34  ;;  %v155_v48 = vsub.f32 %v1070_v35, %v154_v40  ;;  %v188_v50 = vand.u32 4294901760, %v187_v41  ;;  %v826_v54 = vpack.c.bf16 %v174_v45, %v167_v44 }
  0x33   :  { %v201_v52 = vsub.f32 %v1065_v32, %v200_v46  ;;  %v862_v55 = vpack.c.bf16 %v172_v30, %v165_v21  ;;  %v866_v57 = vpack.c.bf16 %v186_v36, %v179_v31  ;;  %v195_v59 = vand.u32 4294901760, %v194_v51 }
  0x34   :  { %825 = vmatpush3.bf16.msra.mxu1 %v1037_v18  ;;  %861 = vmatpush3.bf16.msra.mxu0 %v1037_v18  ;;  %v156_v56 = vand.u32 4294901760, %v155_v48  ;;  %v830_v58 = vpack.c.bf16 %v188_v50, %v181_v49  ;;  %v207_v61 = vand.u32 4294901760, %v206_v53  ;;  %v870_v63 = vpack.c.bf16 %v200_v46, %v193_v42 }
  0x35   :  { %724 = vmatprep.subr.mxu1 %v1083_v43  ;;  %775 = vmatprep.subr.mxu0 %v1083_v43  ;;  %v202_v60 = vand.u32 4294901760, %v201_v52  ;;  %v838_v2 = vpack.c.bf16 %v1044_v22, %v1033_v15  ;;  %v842_v3 = vpack.c.bf16 %v1056_v27, %v1047_v24  ;;  %v846_v4 = vpack.c.bf16 %v1065_v32, %v1058_v28 }
  0x36   :  { %726 = vmatprep.mubr.f32.mxu1 %v146_v47  ;;  %v208_v0 = vsub.f32 %v206_v53, %v207_v61 }
  0x37   :  { %v834_v62 = vpack.c.bf16 %v202_v60, %v195_v59 }
  0x38   :  { %725 = vmatpush3.msra.mxu1 %v1083_v43  ;;  %776 = vmatpush3.msra.mxu0 %v1083_v43  ;;  %v209_v1 = vand.u32 4294901760, %v208_v0 }
  0x39   :  { %827 = vmatprep.subr.bf16.mxu1 %v826_v54  ;;  %863 = vmatprep.subr.bf16.mxu0 %v862_v55 }
  0x3a   :  { %727 = vmatmul.mubr.f32.vlgmr.msra.gmra.mrb[0].mxu1 %v156_v56  ;;  %778 = vmatmul.mubr.f32.vlgmr.msra.gmra.mrb[0].mxu0 %v154_v40 }
  0x3b   :  { %829 = vmatpush3.bf16.msra.mxu1 %v826_v54  ;;  %865 = vmatpush3.bf16.msra.mxu0 %v862_v55 }
  0x3c   :  { %831 = vmatprep.subr.bf16.mxu1 %v830_v58  ;;  %867 = vmatprep.subr.bf16.mxu0 %v866_v57 }
  0x3d   :  { %743 = vmatprep.mubr.f32.mxu1 %v1039_v19  ;;  %794 = vmatprep.mubr.f32.mxu0 %v1039_v19 }
  0x3f   :  { %833 = vmatpush3.bf16.msra.mxu1 %v830_v58  ;;  %869 = vmatpush3.bf16.msra.mxu0 %v866_v57 }
  0x40   :  { %835 = vmatprep.subr.bf16.mxu1 %v834_v62  ;;  %871 = vmatprep.subr.bf16.mxu0 %v870_v63 }
  0x43   :  { %837 = vmatpush3.bf16.msra.mxu1 %v834_v62  ;;  %873 = vmatpush3.bf16.msra.mxu0 %v870_v63 }
  0x44   :  { %741 = vmatprep.subr.mxu1 %v209_v1  ;;  %792 = vmatprep.subr.mxu0 %v207_v61 }
  0x47   :  { %742 = vmatpush3.msra.mxu1 %v209_v1  ;;  %793 = vmatpush3.msra.mxu0 %v207_v61 }
  0x48   :  { %839 = vmatprep.subr.bf16.mxu1 %v838_v2  ;;  %875 = vmatprep.subr.bf16.mxu0 %v1030_v13 }
  0x49   :  { %744 = vmatmul.mubr.f32.vlgmr.msra.gmra.mrb[0].mxu1 %v1054_v26  ;;  %795 = vmatmul.mubr.f32.vlgmr.msra.gmra.mrb[0].mxu0 %v1054_v26 }
  0x4a   :  { %841 = vmatpush3.bf16.msra.mxu1 %v838_v2  ;;  %877 = vmatpush3.bf16.msra.mxu0 %v1030_v13 }
  0x4b   :  { %843 = vmatprep.subr.bf16.mxu1 %v842_v3  ;;  %879 = vmatprep.subr.bf16.mxu0 %v1035_v17 }
  0x4c   :  { %760 = vmatprep.mubr.f32.mxu1 %v1052_v25  ;;  %811 = vmatprep.mubr.f32.mxu0 %v1039_v19 }
  0x4e   :  { %845 = vmatpush3.bf16.msra.mxu1 %v842_v3  ;;  %881 = vmatpush3.bf16.msra.mxu0 %v1035_v17 }
  0x4f   :  { %847 = vmatprep.subr.bf16.mxu1 %v846_v4  ;;  %883 = vmatprep.subr.bf16.mxu0 %v1037_v18 }
  0x52   :  { %849 = vmatpush3.bf16.msra.mxu1 %v846_v4  ;;  %885 = vmatpush3.bf16.msra.mxu0 %v1037_v18 }
  0x53   :  { %758 = vmatprep.subr.mxu1 %v206_v53  ;;  %809 = vmatprep.subr.mxu0 %v1083_v43 }
  0x56   :  { %759 = vmatpush3.msra.mxu1 %v206_v53  ;;  %810 = vmatpush3.msra.mxu0 %v1083_v43 }
  0x57   :  { %761 = vmatmul.mubr.f32.vlgmr.msra.gmra.mrb[0].mxu1 %v1070_v35  ;;  %812 = vmatmul.mubr.f32.vlgmr.msra.gmra.mrb[0].mxu0 %v1054_v26 }
 0x12a   :  { %v762_v6 = vpop.f32.mrb[0].mxu1  ;;  %v813_v7 = vpop.f32.mrb[0].mxu0 }
 0x12b   :  { %v886_v8 = vadd.f32 %v762_v6, %v657_v5  ;;  %v356_v9 = vpop.f32.mrb[1].mxu1  ;;  %v627_v10 = vpop.f32.mrb[1].mxu0 }
 0x12c   :  { %v888_v11 = vadd.f32 %v657_v5, %v356_v9 }
 0x12d   :  { %v887_v12 = vadd.f32 %v886_v8, %v813_v7 }
 0x12e   :  { %v889_v13 = vadd.f32 %v888_v11, %v627_v10 }
 0x12f   :  { %638 = vst.msk [vmem:[#allocation7 + $0x8] sm:$0xff] %vm59_vm0, %v887_v12 }
 0x130   :  { %637 = vst.msk [vmem:[#allocation7] sm:$0xff] %vm59_vm0, %v889_v13 }
 0x131   :  { %958 = shalt.err (!%p955_p6)
}
 0x132   :  { %s959_s15 = scalar_lea.hbm %s1141_s3, 256 }
 0x133   :  { %p960_p7 = scmp.ne.s32.totalorder %s1141_s3, %s959_s15  ;;  %p963_p8 = scmp.lt.u32.totalorder %s959_s15, %s1141_s3 }
 0x135   :  { %p965_p9 = pnand %p963_p8, %p960_p7 }
 0x137   :  { %968 = shalt.err (!%p965_p9)
}
 0x138   :  { %650 = dma.vmem_to_hbm [thread:$0]  %s645_s12, 256, %s1141_s3, [#allocation4], %s976_s22, %s976_s22, %s977_s23  }
 0x139   :  { %973 = dma.done.wait [#allocation4], 256  }
 0x13a   :  { %974 = vsyncadd [#allocation4], 4294967040 }
 0x13b   :  { %654 = vsyncpa [#allocation3], 1 }
 0x13c   :  { %655 = vsyncpa [#allocation6], 1 }
 0x13d   :  { %656 = vsyncpa [#allocation4], 1 }

</bundles_post_ra>
